<compile_context>
chip_gen: v7x
topology: tpu7x:2x2x1
jax: 0.10.0
libtpu: 0.0.40
codegen_flags: <defaults>
</compile_context>

<pallas_src>
import jax
import jax.numpy as jnp
from jax.experimental import pallas as pl
from jax.experimental.pallas import tpu as pltpu


def _round_up(x, m):
    return ((x + m - 1) // m) * m


def _discrete_action_kernel(stim_ref, args_ref, lens_ref,
                            wkt_ref, bkt_ref, wvbd_ref, bvt_ref, sel_ref,
                            out_ref):
    # stim: (TB, H)           input dtype, cast to bf16 for the MXU
    # args: (TB, N*H)         lane-dense candidate features
    # lens: (TB, 1) i32
    # wkt : (H, N*H) bf16     Wk tiled N x along columns
    # bkt : (1, N*H) f32      bk tiled N x
    # wvbd: (N*H, N*H) bf16   block-diagonal kron(I_N, Wv)
    # bvt : (1, N*H) f32      bv tiled N x
    # sel : (N*H, N) bf16     0/1 selector summing each H-lane group
    # out : (TB, N) f32
    f32 = jnp.float32
    bf16 = jnp.bfloat16

    # key branch, pre-tiled to (TB, N*H) so it lines up with the value branch
    # without any lane<->sublane relayout: ReLU(stim @ Wk + bk) repeated N x.
    k_t = jnp.dot(stim_ref[...].astype(bf16), wkt_ref[...],
                  preferred_element_type=f32)
    k_t = jnp.maximum(k_t + bkt_ref[...], 0.0)                   # (TB, N*H) f32

    # value branch: per-candidate ReLU(args_n @ Wv + bv) as ONE dense matmul
    # against the block-diagonal weight (off-block entries are exact zeros, so
    # numerics match the per-candidate matmul bit-for-bit).
    v_t = jnp.dot(args_ref[...].astype(bf16), wvbd_ref[...],
                  preferred_element_type=f32)
    v_t = jnp.maximum(v_t + bvt_ref[...], 0.0)                   # (TB, N*H) f32

    # per-candidate dot-product score: VPU product, then sum each H-lane group
    # via a 0/1 selector matmul (MXU is idle; avoids reshapes/relayouts).
    # k_t, v_t >= 0 (post-ReLU), so the bf16 cast of the product bounds the
    # relative error of the sum at <= 2^-9.
    p = (k_t * v_t).astype(bf16)
    x = jnp.dot(p, sel_ref[...], preferred_element_type=f32)     # (TB, N)

    # zero scores for candidate indices >= lens (torch: x[mask >= lens] = 0).
    idx = jax.lax.broadcasted_iota(jnp.int32, x.shape, 1)
    out_ref[...] = jnp.where(idx >= lens_ref[...], 0.0, x)


def discrete_action_forward(stim, args, lens, wk, bk, wv, bv, *, block_b=None):
    """DiscreteAction.forward(stim, args, lens) with DotReluBlock parameters."""
    B, N, H = args.shape
    assert stim.shape == (B, H)
    NH = N * H

    if lens is None:
        lens = jnp.full((B, 1), N, dtype=jnp.int32)
    lens_i = lens.reshape(B, 1).astype(jnp.int32)

    # (B, N, H) -> (B, N*H) is a free row-major reshape; no dtype cast here
    # (the bf16 cast for the MXU happens in-kernel, hidden under the DMA).
    args2 = args.reshape(B, NH)
    in_item = jnp.dtype(args.dtype).itemsize

    # Tiny one-time parameter transforms (tiled / block-diag / selector forms).
    bf16, f32 = jnp.bfloat16, jnp.float32
    wkt = jnp.tile(wk, (1, N)).astype(bf16)                               # (H, NH)
    bkt = jnp.tile(bk.reshape(1, H), (1, N)).astype(f32)                  # (1, NH)
    wvbd = jnp.kron(jnp.eye(N, dtype=wv.dtype), wv).astype(bf16)          # (NH, NH)
    bvt = jnp.tile(bv.reshape(1, H), (1, N)).astype(f32)                  # (1, NH)
    sel = jnp.kron(jnp.eye(N, dtype=f32), jnp.ones((H, 1), f32)).astype(bf16)  # (NH, N)

    # ---- batch tile size: amortize the ~0.35us/step grid overhead ----
    if block_b is None:
        tb = (2 * 2 ** 20) // max(1, NH * in_item)    # ~2 MiB of args per step
        tb = max(64, min(2048, tb))
        if B >= 128 and tb * 2 > B:                   # keep >=2 steps (v7x 2 TCs)
            tb = _round_up(pl.cdiv(B, 2), 8)
        block_b = tb
    TB = max(8, (int(block_b) // 8) * 8)
    TB = min(TB, _round_up(B, 8))

    # ---- VMEM budget from the PADDED layout of the actual tiles ----
    lanes_nh = _round_up(NH, 128)
    lanes_h = _round_up(H, 128)
    lanes_n = _round_up(N, 128)

    vmem_cap = 64 * 2 ** 20                           # conservative (v7x)
    try:
        vmem_cap = int(pltpu.get_tpu_info().vmem_capacity_bytes)
    except Exception:
        pass
    budget = min(48 * 2 ** 20, (vmem_cap * 3) // 4)

    def vmem_needed(tb):
        tiles = 2 * (tb * lanes_nh * in_item          # args tile (double-buffered)
                     + tb * lanes_h * in_item         # stim tile
                     + tb * 128 * 4                   # lens tile (lane-padded)
                     + tb * lanes_n * 4)              # out tile (lane-padded)
        weights = 2 * (H * lanes_nh * 2 + NH * lanes_nh * 2
                       + 2 * lanes_nh * 4 + NH * lanes_n * 2)
        interm = 4 * tb * lanes_nh * 4                # k_t / v_t / p / MXU tmp
        return tiles + weights + interm

    while TB > 8 and vmem_needed(TB) > budget:
        TB = max(8, ((TB // 2) // 8) * 8)

    grid = (pl.cdiv(B, TB),)    # ragged last block: OOB reads are unspecified
                                # but rows are independent and OOB writes drop.

    vmem_limit = int(min(budget, max(16 * 2 ** 20,
                                     int(vmem_needed(TB) * 1.5) + (2 << 20))))

    flops = 2 * B * H * NH + 2 * B * NH * NH + B * NH + 2 * B * NH * N
    bytes_accessed = (args2.size * in_item
                      + stim.size * jnp.dtype(stim.dtype).itemsize
                      + lens_i.size * 4 + B * N * 4
                      + wkt.size * 2 + wvbd.size * 2 + sel.size * 2
                      + bkt.size * 4 + bvt.size * 4)
    cost = pl.CostEstimate(flops=int(flops), transcendentals=0,
                           bytes_accessed=int(bytes_accessed))

    out = pl.pallas_call(
        _discrete_action_kernel,
        out_shape=jax.ShapeDtypeStruct((B, N), jnp.float32),
        grid=grid,
        in_specs=[
            pl.BlockSpec((TB, H), lambda i: (i, 0)),      # stim tile
            pl.BlockSpec((TB, NH), lambda i: (i, 0)),     # args tile (lane-dense)
            pl.BlockSpec((TB, 1), lambda i: (i, 0)),      # lens tile
            pl.BlockSpec((H, NH), lambda i: (0, 0)),      # Wk tiled   (resident)
            pl.BlockSpec((1, NH), lambda i: (0, 0)),      # bk tiled   (resident)
            pl.BlockSpec((NH, NH), lambda i: (0, 0)),     # Wv blkdiag (resident)
            pl.BlockSpec((1, NH), lambda i: (0, 0)),      # bv tiled   (resident)
            pl.BlockSpec((NH, N), lambda i: (0, 0)),      # selector   (resident)
        ],
        out_specs=pl.BlockSpec((TB, N), lambda i: (i, 0)),
        compiler_params=pltpu.CompilerParams(
            dimension_semantics=("parallel",),
            vmem_limit_bytes=vmem_limit,
        ),
        cost_estimate=cost,
    )(stim, args2, lens_i, wkt, bkt, wvbd, bvt, sel)

    return out


def reference_forward(stim, args, lens, wk, bk, wv, bv):
    # Mirrors the kernel's matmul numerics: bf16 MXU inputs, f32 accumulate,
    # f32 bias/ReLU epilogue; final per-candidate sum in exact f32.
    k = jnp.dot(stim.astype(jnp.bfloat16), wk.astype(jnp.bfloat16),
                preferred_element_type=jnp.float32)
    k = jnp.maximum(k + bk.astype(jnp.float32), 0.0)
    v = jnp.einsum("bnh,hk->bnk", args.astype(jnp.bfloat16),
                   wv.astype(jnp.bfloat16),
                   preferred_element_type=jnp.float32)
    v = jnp.maximum(v + bv.astype(jnp.float32), 0.0)
    x = jnp.sum(k[:, None, :] * v, axis=-1)
    idx = jnp.arange(args.shape[1])[None, :]
    return jnp.where(idx >= lens, 0.0, x)


if __name__ == "__main__":
    # batch (not a tile multiple -> exercises the ragged last block),
    # candidates, hidden dim
    B, N, H = 30, 8, 32

    key = jax.random.PRNGKey(0)
    k1, k2, k3, k4, k5, k6 = jax.random.split(key, 6)

    stim = jax.random.normal(k1, (B, H), dtype=jnp.float32)
    args = jax.random.normal(k2, (B, N, H), dtype=jnp.float32)
    lens = ((jnp.arange(B) % N) + 1).reshape(B, 1).astype(jnp.int32)

    # Deterministic synthetic parameters (DotReluBlock: two h->h linears).
    wk = jax.random.normal(k3, (H, H), dtype=jnp.float32) * 0.1
    bk = jax.random.normal(k4, (1, H), dtype=jnp.float32) * 0.1
    wv = jax.random.normal(k5, (H, H), dtype=jnp.float32) * 0.1
    bv = jax.random.normal(k6, (1, H), dtype=jnp.float32) * 0.1

    # block_b=16 keeps a 2-step ragged grid at this tiny demo size; at
    # production B the default (None) picks ~2 MiB of args per step.
    out = discrete_action_forward(stim, args, lens, wk, bk, wv, bv, block_b=16)
    out = jax.block_until_ready(out)

    ref = reference_forward(stim, args, lens, wk, bk, wv, bv)
    assert out.shape == (B, N)
    assert jnp.allclose(out, ref, atol=1e-2, rtol=1e-2), "mismatch vs reference"

    # Masked positions (candidate index >= lens) must be exactly zero.
    idx = jnp.arange(N)[None, :]
    assert float(jnp.abs(jnp.where(idx >= lens, out, 0.0)).sum()) == 0.0

    print("KERNEL_OK")
</pallas_src>

<mosaic_0001>
module attributes {stable_mosaic.version = 11 : i64} {
  func.func @_discrete_action_kernel(%arg0: i32, %arg1: memref<16x32xf32, #tpu.memory_space<vmem>>, %arg2: memref<16x256xf32, #tpu.memory_space<vmem>>, %arg3: memref<16x1xi32, #tpu.memory_space<vmem>>, %arg4: memref<32x256xbf16, #tpu.memory_space<vmem>>, %arg5: memref<1x256xf32, #tpu.memory_space<vmem>>, %arg6: memref<256x256xbf16, #tpu.memory_space<vmem>>, %arg7: memref<1x256xf32, #tpu.memory_space<vmem>>, %arg8: memref<256x8xbf16, #tpu.memory_space<vmem>>, %arg9: memref<16x8xf32, #tpu.memory_space<vmem>>) attributes {dimension_semantics = [#tpu.dimension_semantics<parallel>], iteration_bounds = array<i64: 2>, scalar_prefetch = 0 : i64, scratch_operands = 0 : i64, tpu.core_type = #tpu.core_type<tc>, window_params = [{transform_indices = @transform_0, window_bounds = array<i64: 16, 32>}, {transform_indices = @transform_1, window_bounds = array<i64: 16, 256>}, {transform_indices = @transform_2, window_bounds = array<i64: 16, 1>}, {pipeline_mode = #tpu.pipeline_mode<synchronous>, transform_indices = @transform_3, window_bounds = array<i64: 32, 256>}, {pipeline_mode = #tpu.pipeline_mode<synchronous>, transform_indices = @transform_4, window_bounds = array<i64: 1, 256>}, {pipeline_mode = #tpu.pipeline_mode<synchronous>, transform_indices = @transform_5, window_bounds = array<i64: 256, 256>}, {pipeline_mode = #tpu.pipeline_mode<synchronous>, transform_indices = @transform_6, window_bounds = array<i64: 1, 256>}, {pipeline_mode = #tpu.pipeline_mode<synchronous>, transform_indices = @transform_7, window_bounds = array<i64: 256, 8>}, {transform_indices = @transform_8, window_bounds = array<i64: 16, 8>}]} {
    %c0 = arith.constant 0 : index
    %c0_0 = arith.constant 0 : index
    %0 = vector.load %arg1[%c0, %c0_0] : memref<16x32xf32, #tpu.memory_space<vmem>>, vector<16x32xf32>
    %1 = arith.truncf %0 : vector<16x32xf32> to vector<16x32xbf16>
    %c0_1 = arith.constant 0 : index
    %c0_2 = arith.constant 0 : index
    %2 = vector.load %arg4[%c0_1, %c0_2] : memref<32x256xbf16, #tpu.memory_space<vmem>>, vector<32x256xbf16>
    %cst = arith.constant dense<0.000000e+00> : vector<16x256xf32>
    %3 = tpu.matmul %1, %2, %cst {dimension_numbers = #tpu.dot_dimension_numbers<[1], [0], [0], [1], [0, 0, 1, 1], [], []>} : vector<16x32xbf16>, vector<32x256xbf16>, vector<16x256xf32> -> vector<16x256xf32>
    %c0_3 = arith.constant 0 : index
    %c0_4 = arith.constant 0 : index
    %4 = vector.load %arg5[%c0_3, %c0_4] : memref<1x256xf32, #tpu.memory_space<vmem>>, vector<1x256xf32>
    %5 = vector.broadcast %4 : vector<1x256xf32> to vector<16x256xf32>
    %6 = arith.addf %3, %5 : vector<16x256xf32>
    %cst_5 = arith.constant 0.000000e+00 : f32
    %7 = vector.broadcast %cst_5 : f32 to vector<16x256xf32>
    %8 = arith.maximumf %6, %7 : vector<16x256xf32>
    %c0_6 = arith.constant 0 : index
    %c0_7 = arith.constant 0 : index
    %9 = vector.load %arg2[%c0_6, %c0_7] : memref<16x256xf32, #tpu.memory_space<vmem>>, vector<16x256xf32>
    %10 = arith.truncf %9 : vector<16x256xf32> to vector<16x256xbf16>
    %c0_8 = arith.constant 0 : index
    %c0_9 = arith.constant 0 : index
    %11 = vector.load %arg6[%c0_8, %c0_9] : memref<256x256xbf16, #tpu.memory_space<vmem>>, vector<256x256xbf16>
    %cst_10 = arith.constant dense<0.000000e+00> : vector<16x256xf32>
    %12 = tpu.matmul %10, %11, %cst_10 {dimension_numbers = #tpu.dot_dimension_numbers<[1], [0], [0], [1], [0, 0, 1, 1], [], []>} : vector<16x256xbf16>, vector<256x256xbf16>, vector<16x256xf32> -> vector<16x256xf32>
    %c0_11 = arith.constant 0 : index
    %c0_12 = arith.constant 0 : index
    %13 = vector.load %arg7[%c0_11, %c0_12] : memref<1x256xf32, #tpu.memory_space<vmem>>, vector<1x256xf32>
    %14 = vector.broadcast %13 : vector<1x256xf32> to vector<16x256xf32>
    %15 = arith.addf %12, %14 : vector<16x256xf32>
    %cst_13 = arith.constant 0.000000e+00 : f32
    %16 = vector.broadcast %cst_13 : f32 to vector<16x256xf32>
    %17 = arith.maximumf %15, %16 : vector<16x256xf32>
    %18 = arith.mulf %8, %17 : vector<16x256xf32>
    %19 = arith.truncf %18 : vector<16x256xf32> to vector<16x256xbf16>
    %c0_14 = arith.constant 0 : index
    %c0_15 = arith.constant 0 : index
    %20 = vector.load %arg8[%c0_14, %c0_15] : memref<256x8xbf16, #tpu.memory_space<vmem>>, vector<256x8xbf16>
    %cst_16 = arith.constant dense<0.000000e+00> : vector<16x8xf32>
    %21 = tpu.matmul %19, %20, %cst_16 {dimension_numbers = #tpu.dot_dimension_numbers<[1], [0], [0], [1], [0, 0, 1, 1], [], []>} : vector<16x256xbf16>, vector<256x8xbf16>, vector<16x8xf32> -> vector<16x8xf32>
    %22 = tpu.iota {dimensions = array<i32: 1>} : vector<16x8xi32>
    %c0_17 = arith.constant 0 : index
    %c0_18 = arith.constant 0 : index
    %23 = vector.load %arg3[%c0_17, %c0_18] : memref<16x1xi32, #tpu.memory_space<vmem>>, vector<16x1xi32>
    %24 = vector.broadcast %23 : vector<16x1xi32> to vector<16x8xi32>
    %25 = arith.cmpi sge, %22, %24 : vector<16x8xi32>
    %cst_19 = arith.constant 0.000000e+00 : f32
    %26 = vector.broadcast %cst_19 : f32 to vector<16x8xf32>
    %27 = arith.select %25, %26, %21 : vector<16x8xi1>, vector<16x8xf32>
    %c0_20 = arith.constant 0 : index
    %c0_21 = arith.constant 0 : index
    %28 = vector.load %arg9[%c0_20, %c0_21] : memref<16x8xf32, #tpu.memory_space<vmem>>, vector<16x8xf32>
    tpu.vector_store %arg9[%c0_20, %c0_21], %27 {strides = array<i32>} : memref<16x8xf32, #tpu.memory_space<vmem>>, vector<16x8xf32>,
    return
  }
  func.func @transform_0(%arg0: i32) -> (i32, i32) {
    %c0_i32 = arith.constant 0 : i32
    %c0_i32_0 = arith.constant 0 : i32
    return %arg0, %c0_i32 : i32, i32
  }
  func.func @transform_1(%arg0: i32) -> (i32, i32) {
    %c0_i32 = arith.constant 0 : i32
    %c0_i32_0 = arith.constant 0 : i32
    return %arg0, %c0_i32 : i32, i32
  }
  func.func @transform_2(%arg0: i32) -> (i32, i32) {
    %c0_i32 = arith.constant 0 : i32
    %c0_i32_0 = arith.constant 0 : i32
    return %arg0, %c0_i32 : i32, i32
  }
  func.func @transform_3(%arg0: i32) -> (i32, i32) {
    %c0_i32 = arith.constant 0 : i32
    %c0_i32_0 = arith.constant 0 : i32
    %c0_i32_1 = arith.constant 0 : i32
    return %c0_i32, %c0_i32_0 : i32, i32
  }
  func.func @transform_4(%arg0: i32) -> (i32, i32) {
    %c0_i32 = arith.constant 0 : i32
    %c0_i32_0 = arith.constant 0 : i32
    %c0_i32_1 = arith.constant 0 : i32
    return %c0_i32, %c0_i32_0 : i32, i32
  }
  func.func @transform_5(%arg0: i32) -> (i32, i32) {
    %c0_i32 = arith.constant 0 : i32
    %c0_i32_0 = arith.constant 0 : i32
    %c0_i32_1 = arith.constant 0 : i32
    return %c0_i32, %c0_i32_0 : i32, i32
  }
  func.func @transform_6(%arg0: i32) -> (i32, i32) {
    %c0_i32 = arith.constant 0 : i32
    %c0_i32_0 = arith.constant 0 : i32
    %c0_i32_1 = arith.constant 0 : i32
    return %c0_i32, %c0_i32_0 : i32, i32
  }
  func.func @transform_7(%arg0: i32) -> (i32, i32) {
    %c0_i32 = arith.constant 0 : i32
    %c0_i32_0 = arith.constant 0 : i32
    %c0_i32_1 = arith.constant 0 : i32
    return %c0_i32, %c0_i32_0 : i32, i32
  }
  func.func @transform_8(%arg0: i32) -> (i32, i32) {
    %c0_i32 = arith.constant 0 : i32
    %c0_i32_0 = arith.constant 0 : i32
    return %arg0, %c0_i32 : i32, i32
  }
}

</mosaic_0001>

<bundles_post_ra>
// kernel: tpu_custom_call.1
= control target key start
LH: loop header
LB: loop body
LE: loop exit
PB: predicated region body
PF: predicated region fallthrough
CT: control target
= control target key end

     0   :  { %13 = vsyncpa [#allocation3], 0  ;;  %s1279_s27 = smov 0   ;;  %s1421_s0 = inlined_call_operand.vmem [shape: f32[30,32], index: 0, kind: input, shape index: {}]   ;;  %s1422_s1 = inlined_call_operand.vmem [shape: f32[30,256], index: 1, kind: input, shape index: {}]   ;;  %s1423_s2 = inlined_call_operand.vmem [shape: s32[30,1], index: 2, kind: input, shape index: {}]   ;;  %s1424_s3 = inlined_call_operand.vmem [shape: bf16[32,256], index: 3, kind: input, shape index: {}]   ;;  %s1425_s4 = inlined_call_operand.vmem [shape: f32[1,256], index: 4, kind: input, shape index: {}]   ;;  %s1426_s5 = inlined_call_operand.hbm [shape: bf16[256,256], index: 5, kind: input, shape index: {}]   ;;  %s1427_s6 = inlined_call_operand.vmem [shape: f32[1,256], index: 6, kind: input, shape index: {}]   ;;  %s1428_s7 = inlined_call_operand.vmem [shape: bf16[256,8], index: 7, kind: input, shape index: {}]   ;;  %s1429_s8 = inlined_call_operand.vmem [shape: f32[30,8], index: 8, kind: output, shape index: {}]  }
   0x1 LB: > { %s1003_s28 = sadd.s32 4294967295, %s1228_s27   ;;  %p1005_p0 = scmp.ge.s32.totalorder %s1228_s27, 1  ;;  %s1228_s27 = sphi %s1279_s27, %s19_s27  }
   0x2   : > { %p233_p1 = scmp.lt.s32.totalorder %s1228_s27, 3  ;;  %s1230_s29 = smov [#allocation2]  }
   0x3   : > { %s251_s30 = sshll.u32 %s1230_s29, 4  ;;  %p1293_p3 = scmp.eq.s32.totalorder %s1003_s28, 0  ;;  %s252_s30 = int_to_ptr.vmem [resolvable:$true] %s251_s30 }
   0x4   : > { %p1287_p2 = pnand %p1005_p0, %p233_p1  ;;  %s1190_s14 = scalar_lea.hbm %s1426_s5, 4096 }
   0x5   : > { %s1434_s10 = scalar_select %p1293_p3, 1, 0 }
   0x6   : > { %s1433_s9 = scalar_select %p1287_p2, 1, 0 }
   0x7   : > { %p1101_p4 = pneg %p1287_p2  ;;  %p1191_p6 = scmp.ne.s32.totalorder %s1426_s5, %s1190_s14 }
   0x8   : > { %p1197_p10 = scmp.lt.u32.totalorder %s1190_s14, %s1426_s5 }
   0x9   : > { %p1301_p5 = pnand %p1293_p3, %p1101_p4 }
   0xb   : > { %p1192_p7 = pneg %p1301_p5 }
   0xd   : > { %p1193_p8 = pnand %p1192_p7, %p1191_p6 }
   0xf   : > { %p1194_p9 = pneg %p1193_p8 }
  0x11   : > { %p1199_p11 = pnand %p1197_p10, %p1194_p9 }
  0x13   : > { %1202 = shalt.err (!%p1199_p11)
}
  0x14   : > { %s1203_s19 = scalar_lea.vmem %s252_s30, 4096  ;;  %p1211_p1 = scmp.lt.s32.totalorder %s252_s30, %s252_s30 }
  0x15   : > { %p1204_p12 = scmp.ne.s32.totalorder %s252_s30, %s1203_s19  ;;  %p1212_p4 = scmp.lt.s32.totalorder %s1203_s19, %s1203_s19 }
  0x17   : > { %p1206_p13 = pnand %p1204_p12, %p1192_p7  ;;  %p1213_p3 = por %p1212_p4, %p1211_p1 }
  0x19   : > { %p1207_p0 = pneg %p1206_p13 }
  0x1b   : > { %p1214_p2 = pnand %p1213_p3, %p1207_p0 }
  0x1d   : > { %1217 = shalt.err (!%p1214_p2)
}
  0x1e   : > { %s1231_s20 = smov 128   ;;  %s1232_s21 = smov 8  }
  0x1f   : > { %1104 = dma.hbm_to_vmem [thread:$0]  (!%p1301_p5), %s1426_s5, 4096, %s252_s30, [#allocation3], %s1231_s20, %s1231_s20, %s1232_s21  }
  0x20   : > { %p1436_p6 = scmp.ne.s32.totalorder %s1433_s9, 0 }
  0x21   : > { %p1437_p8 = scmp.ne.s32.totalorder (!%p1436_p6), %s1434_s10, 0 }
  0x22   : > { %301 = sbr.rel (%p1436_p6) target bundleno = 551 (0x227), region = 52 }
  0x29   : > { %1223 = dma.done.wait (%p1437_p8), [#allocation3], 4096  }
  0x2a   : > { %1225 = vsyncadd (%p1437_p8), [#allocation3], 4294963200  ;;  %v1233_v0 = vmov 0   ;;  %v1120_v1 = vld [vmem:[#allocation2 + $0x4] ss:$8 sps:$4 sm:$0xff]   ;;  %s1010_s24 = sshll.u32 %s1003_s28, 1 }
  0x2b   : > { %447 = vmatprep.mubr.bf16.mxu0 %v1233_v0  ;;  %1119 = vset.pattern.permute.xlu0 %v1233_v0  ;;  %v1122_v2 = vld [vmem:[#allocation2] ss:$8 sps:$4 sm:$0xff]   ;;  %v1123_v3 = vld [vmem:[#allocation2 + $0x14] ss:$8 sps:$4 sm:$0xff]   ;;  %v1125_v4 = vld [vmem:[#allocation2 + $0x10] ss:$8 sps:$4 sm:$0xff]  }
  0x2c   : > { %672 = vmatprep.subr.bf16.mxu1 %v1120_v1  ;;  %v1126_v5 = vld [vmem:[#allocation2 + $0x24] ss:$8 sps:$4 sm:$0xff]   ;;  %v1128_v6 = vld [vmem:[#allocation2 + $0x20] ss:$8 sps:$4 sm:$0xff]   ;;  %v1129_v7 = vld [vmem:[#allocation2 + $0x34] ss:$8 sps:$4 sm:$0xff]  }
  0x2d   : > { %673 = vmatpush1.bf16.msra.mxu1 %v1122_v2  ;;  %p347_p2 = scmp.lt.s32.totalorder %s1010_s24, 3  ;;  %v1131_v8 = vld [vmem:[#allocation2 + $0x30] ss:$8 sps:$4 sm:$0xff]   ;;  %v1132_v9 = vld [vmem:[#allocation2 + $0x44] ss:$8 sps:$4 sm:$0xff]   ;;  %vm411_vm0 = vcmask 261120  }
  0x2e   : > { %674 = vmatprep.subr.bf16.mxu1 %v1123_v3  ;;  %v1134_v10 = vld [vmem:[#allocation2 + $0x40] ss:$8 sps:$4 sm:$0xff]   ;;  %v1135_v11 = vld [vmem:[#allocation2 + $0x54] ss:$8 sps:$4 sm:$0xff]   ;;  %v1137_v12 = vld [vmem:[#allocation2 + $0x50] ss:$8 sps:$4 sm:$0xff]  }
  0x2f   : > { %s1439_s24 = smov (!%p347_p2, %s1010_s24), 3  ;;  %v1161_v13 = vld [vmem:[%s1424_s3 + $0x4] ss:$8 sps:$4 sm:$0xff]   ;;  %v1164_v14 = vld [vmem:[%s1424_s3] ss:$8 sps:$4 sm:$0xff]   ;;  %v1178_v33 = vld [vmem:[%s1428_s7 + $0x50] sm:$0xff]  }
  0x30   : > { %s1329_s25 = sshll.u32 %s1439_s24, 3  ;;  %s1074_s26 = sshll.u32 %s1439_s24, 4  ;;  %v1138_v15 = vld [vmem:[#allocation2 + $0x64] ss:$8 sps:$4 sm:$0xff]   ;;  %415 = vmatprep.subr.bf16.mxu0 %v1161_v13  ;;  %v1167_v16 = vld [vmem:[%s1424_s3 + $0x14] ss:$8 sps:$4 sm:$0xff]  }
  0x31   : > { %675 = vmatpush1.bf16.msra.mxu1 %v1125_v4  ;;  %s350_s12 = scalar_lea.vmem %s1421_s0, %s1329_s25  ;;  %s1347_s17 = scalar_lea.vmem %s1422_s1, %s1074_s26  ;;  %416 = vmatpush1.bf16.msra.mxu0 %v1164_v14  ;;  %v1170_v17 = vld [vmem:[%s1424_s3 + $0x10] ss:$8 sps:$4 sm:$0xff]   ;;  %v1140_v18 = vld [vmem:[#allocation2 + $0x60] ss:$8 sps:$4 sm:$0xff]   ;;  %v1141_v20 = vld [vmem:[#allocation2 + $0x74] ss:$8 sps:$4 sm:$0xff]   ;;  %v381_v4 = vlaneseq }
  0x32   : > { %676 = vmatprep.subr.bf16.mxu1 %v1126_v5  ;;  %417 = vmatprep.subr.bf16.mxu0 %v1167_v16  ;;  %v372_v19 = vld [vmem:[%s350_s12] sm:$0xff]  ;;  %v373_v21 = vld [vmem:[%s350_s12 + $0x8] sm:$0xff]  ;;  %v1143_v23 = vld [vmem:[#allocation2 + $0x70] ss:$8 sps:$4 sm:$0xff]   ;;  %s363_s14 = scalar_lea.vmem %s1423_s2, %s1329_s25  ;;  %s369_s22 = scalar_lea.vmem %s1429_s8, %s1329_s25  ;;  %vm908_vm1 = vcmask 64512  }
  0x33   : > { %v463_v22 = vld [vmem:[%s1347_s17 + $0x8] sm:$0xff]  ;;  %v374_v24 = vpack.c.bf16 %v373_v21, %v372_v19  ;;  %v465_v25 = vld [vmem:[%s1347_s17 + $0x18] sm:$0xff]  ;;  %v1174_v28 = vld [vmem:[%s1428_s7 + $0x40] sm:$0xff]   ;;  %v382_v5 = vshrl.u32 %v381_v4, 7 }
  0x34   : > { %v1144_v26 = vld [vmem:[#allocation2 + $0x84] ss:$8 sps:$4 sm:$0xff]   ;;  %v467_v27 = vpack.c.bf16 %v465_v25, %v463_v22  ;;  %v1146_v31 = vld [vmem:[#allocation2 + $0x80] ss:$8 sps:$4 sm:$0xff]   ;;  %v1147_v34 = vld [vmem:[#allocation2 + $0x94] ss:$8 sps:$4 sm:$0xff]  }
  0x35   : > { %677 = vmatpush1.bf16.msra.mxu1 %v1128_v6  ;;  %418 = vmatpush1.bf16.msra.mxu0 %v1170_v17  ;;  %v1175_v29 = vld [vmem:[%s1428_s7] sm:$0xff]   ;;  %v1176_v30 = vld [vmem:[%s1428_s7 + $0x48] sm:$0xff]   ;;  %v1149_v35 = vld [vmem:[#allocation2 + $0x90] ss:$8 sps:$4 sm:$0xff]   ;;  %v383_v6 = vsub.s32 0, %v382_v5 }
  0x36   : > { %678 = vmatprep.subr.bf16.mxu1 %v1129_v7  ;;  %704 = vmatprep.mubr.bf16.mxu1 %v467_v27  ;;  %v1177_v32 = vld [vmem:[%s1428_s7 + $0x8] sm:$0xff]   ;;  %v1179_v36 = vld [vmem:[%s1428_s7 + $0x10] sm:$0xff]   ;;  %v1180_v38 = vld [vmem:[%s1428_s7 + $0x58] sm:$0xff]  }
  0x37   : > { %1075 = vmatprep.subr.bf16.mxu0 %v1174_v28  ;;  %v1150_v37 = vld [vmem:[#allocation2 + $0xa4] ss:$8 sps:$4 sm:$0xff]   ;;  %v1181_v39 = vld [vmem:[%s1428_s7 + $0x18] sm:$0xff]   ;;  %v1152_v40 = vld [vmem:[#allocation2 + $0xa0] ss:$8 sps:$4 sm:$0xff]  }
  0x38   : > { %1023 = vmatmul.mubr.msk.bf16.vlgmr.msra.gmra.mrb[0].mxu0 %vm411_vm0, %v374_v24  ;;  %v1153_v41 = vld [vmem:[#allocation2 + $0xb4] ss:$8 sps:$4 sm:$0xff]   ;;  %v1155_v42 = vld [vmem:[#allocation2 + $0xb0] ss:$8 sps:$4 sm:$0xff]   ;;  %v1156_v43 = vld [vmem:[#allocation2 + $0xc4] ss:$8 sps:$4 sm:$0xff]  }
  0x39   : > { %679 = vmatpush1.bf16.msra.mxu1 %v1131_v8  ;;  %1076 = vmatpush3.bf16.msra.mxu0 %v1175_v29  ;;  %v1158_v44 = vld [vmem:[#allocation2 + $0xc0] ss:$8 sps:$4 sm:$0xff]   ;;  %v1159_v45 = vld [vmem:[#allocation2 + $0xd4] ss:$8 sps:$4 sm:$0xff]   ;;  %v1163_v46 = vld [vmem:[#allocation2 + $0xd0] ss:$8 sps:$4 sm:$0xff]  }
  0x3a   : > { %680 = vmatprep.subr.bf16.mxu1 %v1132_v9  ;;  %1077 = vmatprep.subr.bf16.mxu0 %v1176_v30  ;;  %v1165_v47 = vld [vmem:[#allocation2 + $0xe4] ss:$8 sps:$4 sm:$0xff]   ;;  %v1169_v48 = vld [vmem:[#allocation2 + $0xe0] ss:$8 sps:$4 sm:$0xff]   ;;  %v1171_v49 = vld [vmem:[#allocation2 + $0xf4] ss:$8 sps:$4 sm:$0xff]  }
  0x3b   : > { %v1173_v50 = vld [vmem:[#allocation2 + $0xf0] ss:$8 sps:$4 sm:$0xff]   ;;  %v462_v51 = vld [vmem:[%s1347_s17] sm:$0xff]  ;;  %v1184_v56 = vld [vmem:[%s1428_s7 + $0x68] sm:$0xff]   ;;  %v387_v8 = vsub.s32 1, %v382_v5 }
  0x3c   : > { %v464_v52 = vld [vmem:[%s1347_s17 + $0x10] sm:$0xff]  ;;  %v1182_v54 = vld [vmem:[%s1428_s7 + $0x60] sm:$0xff]   ;;  %v1185_v57 = vld [vmem:[%s1428_s7 + $0x28] sm:$0xff]  }
  0x3d   : > { %681 = vmatpush1.bf16.msra.mxu1 %v1134_v10  ;;  %1078 = vmatpush3.bf16.msra.mxu0 %v1177_v32  ;;  %v466_v53 = vpack.c.bf16 %v464_v52, %v462_v51  ;;  %v1183_v55 = vld [vmem:[%s1428_s7 + $0x20] sm:$0xff]   ;;  %v1186_v58 = vld [vmem:[%s1428_s7 + $0x70] sm:$0xff]   ;;  %v1188_v60 = vld [vmem:[%s1428_s7 + $0x78] sm:$0xff]  }
  0x3e   : > { %682 = vmatprep.subr.bf16.mxu1 %v1135_v11  ;;  %1079 = vmatprep.subr.bf16.mxu0 %v1178_v33  ;;  %v1187_v59 = vld [vmem:[%s1428_s7 + $0x30] sm:$0xff]   ;;  %v1189_v61 = vld [vmem:[%s1428_s7 + $0x38] sm:$0xff]   ;;  %v896_v62 = vld [vmem:[%s363_s14] sm:$0xff] }
  0x3f   : > { %899 = vperm.xlu0 %1119, %v896_v62   ;;  %v897_v63 = vld [vmem:[%s363_s14 + $0x8] sm:$0xff]  ;;  %v379_v7 = vld [vmem:[%s1425_s4] sm:$0x3] }
  0x40   : > { %v384_v9 = vrot.slane %v379_v7, %v383_v6  ;;  %v388_v10 = vrot.slane %v379_v7, %v387_v8  ;;  %v500_v11 = vld [vmem:[%s1427_s6] sm:$0x3] }
  0x41   : > { %683 = vmatpush1.bf16.msra.mxu1 %v1137_v12  ;;  %1080 = vmatpush3.bf16.msra.mxu0 %v1179_v36  ;;  %v505_v13 = vrot.slane %v500_v11, %v383_v6 }
  0x42   : > { %684 = vmatprep.subr.bf16.mxu1 %v1138_v15  ;;  %1081 = vmatprep.subr.bf16.mxu0 %v1180_v38  ;;  %v509_v15 = vrot.slane %v500_v11, %v387_v8 }
  0x43   : > { %902 = vperm.xlu0 %1119, %v897_v63  }
  0x45   : > { %685 = vmatpush1.bf16.msra.mxu1 %v1140_v18  ;;  %1082 = vmatpush3.bf16.msra.mxu0 %v1181_v39 }
  0x46   : > { %686 = vmatprep.subr.bf16.mxu1 %v1141_v20  ;;  %1083 = vmatprep.subr.bf16.mxu0 %v1182_v54 }
  0x49   : > { %687 = vmatpush1.bf16.msra.mxu1 %v1143_v23  ;;  %1084 = vmatpush3.bf16.msra.mxu0 %v1183_v55 }
  0x4a   : > { %688 = vmatprep.subr.bf16.mxu1 %v1144_v26  ;;  %1085 = vmatprep.subr.bf16.mxu0 %v1184_v56 }
  0x4d   : > { %689 = vmatpush1.bf16.msra.mxu1 %v1146_v31  ;;  %1086 = vmatpush3.bf16.msra.mxu0 %v1185_v57 }
  0x4e   : > { %690 = vmatprep.subr.bf16.mxu1 %v1147_v34  ;;  %1087 = vmatprep.subr.bf16.mxu0 %v1186_v58 }
  0x51   : > { %691 = vmatpush1.bf16.msra.mxu1 %v1149_v35  ;;  %1088 = vmatpush3.bf16.msra.mxu0 %v1187_v59 }
  0x52   : > { %692 = vmatprep.subr.bf16.mxu1 %v1150_v37  ;;  %1089 = vmatprep.subr.bf16.mxu0 %v1188_v60 }
  0x55   : > { %693 = vmatpush1.bf16.msra.mxu1 %v1152_v40  ;;  %1090 = vmatpush3.bf16.msra.mxu0 %v1189_v61 }
  0x56   : > { %694 = vmatprep.subr.bf16.mxu1 %v1153_v41  ;;  %v895_v41 = vand.u32 127, %v381_v4 }
  0x59   : > { %695 = vmatpush1.bf16.msra.mxu1 %v1155_v42 }
  0x5a   : > { %696 = vmatprep.subr.bf16.mxu1 %v1156_v43 }
  0x5d   : > { %697 = vmatpush1.bf16.msra.mxu1 %v1158_v44 }
  0x5e   : > { %698 = vmatprep.subr.bf16.mxu1 %v1159_v45 }
  0x61   : > { %699 = vmatpush1.bf16.msra.mxu1 %v1163_v46 }
  0x62   : > { %700 = vmatprep.subr.bf16.mxu1 %v1165_v47 }
  0x65   : > { %701 = vmatpush1.bf16.msra.mxu1 %v1169_v48 }
  0x66   : > { %702 = vmatprep.subr.bf16.mxu1 %v1171_v49 }
  0x69   : > { %703 = vmatpush1.bf16.msra.mxu1 %v1173_v50 }
  0x6c   : > { %705 = vmatmul.mubr.bf16.vlgmr.msra.gmra.mrb[0].mxu1 %v466_v53 }
  0xbe   : > { %v900_v40 = vpop.permute.xlu0 %899 }
  0xbf   : > { %vm904_vm2 = vcmp.ge.s32.totalorder %v895_v41, %v900_v40 }
  0xc2   : > { %v903_v44 = vpop.permute.xlu0 %902 }
  0xc3   : > { %vm905_vm3 = vcmp.ge.s32.totalorder %v895_v41, %v903_v44 }
 0x10b   : > { %v449_v0 = vpop.f32.mrb[0].mxu0 }
 0x10c   : > { %v451_v1 = vpop.f32.mrb[1].mxu0  ;;  %v450_v12 = vadd.f32 %v449_v0, %v384_v9 }
 0x10d   : > { %v453_v2 = vpop.f32.mrb[2].mxu0  ;;  %v452_v14 = vadd.f32 %v451_v1, %v388_v10 }
 0x10e   : > { %v455_v3 = vpop.f32.mrb[3].mxu0  ;;  %v458_v17 = vmax.f32 %v450_v12, 0.0  ;;  %v454_v18 = vadd.f32 %v453_v2, %v384_v9 }
 0x10f   : > { %v459_v21 = vmax.f32 %v452_v14, 0.0  ;;  %v456_v22 = vadd.f32 %v455_v3, %v388_v10 }
 0x110   : > { %v460_v30 = vmax.f32 %v454_v18, 0.0 }
 0x111   : > { %v461_v33 = vmax.f32 %v456_v22, 0.0 }
 0x13f   : > { %v706_v16 = vpop.f32.mrb[0].mxu1 }
 0x140   : > { %v707_v19 = vadd.f32 %v706_v16, %v505_v13  ;;  %v708_v20 = vpop.f32.mrb[1].mxu1 }
 0x141   : > { %v709_v23 = vadd.f32 %v708_v20, %v509_v15  ;;  %v710_v24 = vpop.f32.mrb[2].mxu1 }
 0x142   : > { %v715_v25 = vmax.f32 %v707_v19, 0.0  ;;  %v711_v26 = vadd.f32 %v710_v24, %v505_v13  ;;  %v712_v27 = vpop.f32.mrb[3].mxu1 }
 0x143   : > { %v716_v28 = vmax.f32 %v709_v23, 0.0  ;;  %v713_v29 = vadd.f32 %v712_v27, %v509_v15 }
 0x144   : > { %v719_v31 = vmul.f32 %v715_v25, %v458_v17  ;;  %v717_v32 = vmax.f32 %v711_v26, 0.0 }
 0x145   : > { %v720_v34 = vmul.f32 %v716_v28, %v459_v21  ;;  %v718_v35 = vmax.f32 %v713_v29, 0.0 }
 0x146   : > { %v721_v36 = vmul.f32 %v717_v32, %v460_v30 }
 0x147   : > { %v722_v37 = vmul.f32 %v718_v35, %v461_v33 }
 0x148   : > { %v723_v38 = vpack.c.bf16 %v721_v36, %v719_v31 }
 0x149   : > { %v724_v39 = vpack.c.bf16 %v722_v37, %v720_v34 }
 0x14b   : > { %885 = vmatprep.mubr.bf16.mxu0 %v724_v39 }
 0x14c   : > { %886 = vmatmul.mubr.bf16.vlgmr.msra.gmra.mrb[4].mxu0 %v723_v38 }
 0x21f   : > { %v1091_v42 = vpop.f32.mrb[4].mxu0 }
 0x220   : > { %v1092_v43 = vpop.f32.mrb[5].mxu0 }
 0x221   : > { %v1093_v45 = vadd.f32 %v1092_v43, %v1091_v42  ;;  %v1094_v46 = vpop.f32.mrb[6].mxu0 }
 0x222   : > { %v1095_v47 = vpop.f32.mrb[7].mxu0 }
 0x223   : > { %v906_v48 = vsel %vm904_vm2, 0.0, %v1093_v45  ;;  %v1096_v49 = vadd.f32 %v1095_v47, %v1094_v46 }
 0x224   : > { %909 = vst.msk [vmem:[%s369_s22] sm:$0xff] %vm908_vm1, %v906_v48 }
 0x225   : > { %v907_v50 = vsel %vm905_vm3, 0.0, %v1096_v49 }
 0x226   : > { %910 = vst.msk [vmem:[%s369_s22 + $0x8] sm:$0xff] %vm908_vm1, %v907_v50 }
 0x227 PF: > { %s19_s27 = sadd.s32 1, %s1228_s27  }
 0x228   : > { %p16_p3 = scmp.ge.s32.totalorder %s19_s27, 4  }
 0x22a   :  { %18 = sbr.rel (!%p16_p3) target bundleno = 1 (0x1), region = 93 }
 0x231   :  { %933 = vsyncpa [#allocation3], 1 }
 0x232   :  { %935 = vsyncpa [#allocation3 + $0x1], 1 }

</bundles_post_ra>
